<compile_context>
chip_gen: v6e
topology: v6e:2x2x1
jax: 0.10.0
libtpu: 0.0.40
codegen_flags: <defaults>
</compile_context>

<pallas_src>
import functools

import jax
import jax.numpy as jnp
from jax.experimental import pallas as pl
from jax.experimental.pallas import tpu as pltpu


_MAX_NODE_TILE = 512  # nodes (lanes) per grid step; keeps vreg pressure well inside the file


def _round_up(x, m):
    return ((x + m - 1) // m) * m


def _node_layer_kernel(flags_ref, xu_ref, xo_ref, wp_ref, wn_ref, bias_ref,
                       cu_ref, co_ref, deg_ref):
    """One node tile: coefficients + degree flags for the 'under' and 'over' combinations.

    flags_ref : SMEM (2,) int32  -- [any(|under|)>0, any(|over|)>0]  (loop invariant)
    xu_ref    : (V1, W)  = layer_inputs_under.T   (constant across the grid)
    xo_ref    : (V1, W)  = layer_inputs_over.T
    wp_ref    : (W, T)   node tile of pos_weights.T   (nodes on lanes)
    wn_ref    : (W, T)   node tile of neg_weights.T
    bias_ref  : (1, T)
    cu_ref    : (V1, T)  "under" coefficients (bias fused)
    co_ref    : (V1, T)  "over" coefficients
    deg_ref   : (2, T)   row 0 = under degree flag, row 1 = over degree flag
    """
    f32 = jnp.float32
    xu = xu_ref[...]
    xo = xo_ref[...]
    wp = wp_ref[...]
    wn = wn_ref[...]
    b = bias_ref[...]

    # under = pos@under + neg@over + bias ; over = pos@over + neg@under + bias  (all nodes at once)
    cu_ref[...] = (jnp.dot(xu, wp, preferred_element_type=f32)
                   + jnp.dot(xo, wn, preferred_element_type=f32) + b)
    co_ref[...] = (jnp.dot(xo, wp, preferred_element_type=f32)
                   + jnp.dot(xu, wn, preferred_element_type=f32) + b)

    # degree = 1 unless the contributing weights or inputs are identically zero
    p_nz = jnp.max(jnp.abs(wp), axis=0, keepdims=True) > 0.0   # (1, T) per-node pos nonzero
    n_nz = jnp.max(jnp.abs(wn), axis=0, keepdims=True) > 0.0   # (1, T) per-node neg nonzero
    u_nz = flags_ref[0] > 0                                    # scalar: under input nonzero
    o_nz = flags_ref[1] > 0                                    # scalar: over input nonzero
    deg_ref[0:1, :] = ((p_nz & u_nz) | (n_nz & o_nz)).astype(f32)
    deg_ref[1:2, :] = ((n_nz & u_nz) | (p_nz & o_nz)).astype(f32)


@functools.partial(jax.jit, static_argnums=(0,))
def node_layer_forward(n_vars, intervals, pos_weights, neg_weights, biases,
                       layer_inputs_under, layer_inputs_over):
    """Batched (over nodes) NodeModule.forward, activation == 'linear'.

    pos_weights, neg_weights: (N, W); biases: (N,); layer_inputs_*: (W, n_vars+1);
    intervals: (n_vars, 2).
    Returns ibf_under (N, (n_vars+1)*n_vars, 2), ibf_over (same shape),
    under_degrees (N, n_vars), over_degrees (N, n_vars).
    """
    f32 = jnp.float32
    V1 = n_vars + 1
    R = V1 * n_vars

    under = jnp.asarray(layer_inputs_under, f32)      # (W, V1)
    over = jnp.asarray(layer_inputs_over, f32)
    pos = jnp.asarray(pos_weights, f32)               # (N, W)
    neg = jnp.asarray(neg_weights, f32)
    bias = jnp.asarray(biases, f32).reshape(-1)       # (N,)

    W = under.shape[0]
    N = pos.shape[0]

    # Node tile: as large as possible (amortize the ~0.35us/step overhead), but keep >= 2 grid
    # steps when the node count allows so the "parallel" axis shards across v7x's two cores.
    T = min(_MAX_NODE_TILE, max(128, _round_up(-(-N // 2), 128)))
    n_tiles = -(-N // T)
    N_pad = n_tiles * T
    pad = N_pad - N

    # Plain pad + transpose (no per-tile interleave): nodes land on lanes.
    wp = jnp.pad(pos, ((0, pad), (0, 0))).T           # (W, N_pad)
    wn = jnp.pad(neg, ((0, pad), (0, 0))).T
    bias_row = jnp.pad(bias, ((0, pad),)).reshape(1, N_pad)

    x_u = under.T                                     # (V1, W)
    x_o = over.T

    # loop-invariant input-nonzero flags -> SMEM via scalar prefetch
    flags = jnp.stack([jnp.any(under != 0.0), jnp.any(over != 0.0)]).astype(jnp.int32)

    grid_spec = pltpu.PrefetchScalarGridSpec(
        num_scalar_prefetch=1,
        grid=(n_tiles,),
        in_specs=[pl.BlockSpec((V1, W), lambda i, flags: (0, 0)),
                  pl.BlockSpec((V1, W), lambda i, flags: (0, 0)),
                  pl.BlockSpec((W, T), lambda i, flags: (0, i)),
                  pl.BlockSpec((W, T), lambda i, flags: (0, i)),
                  pl.BlockSpec((1, T), lambda i, flags: (0, i))],
        out_specs=(pl.BlockSpec((V1, T), lambda i, flags: (0, i)),
                   pl.BlockSpec((V1, T), lambda i, flags: (0, i)),
                   pl.BlockSpec((2, T), lambda i, flags: (0, i))),
    )

    cu, co, deg = pl.pallas_call(
        _node_layer_kernel,
        out_shape=(jax.ShapeDtypeStruct((V1, N_pad), f32),
                   jax.ShapeDtypeStruct((V1, N_pad), f32),
                   jax.ShapeDtypeStruct((2, N_pad), f32)),
        grid_spec=grid_spec,
        compiler_params=pltpu.CompilerParams(dimension_semantics=("parallel",)),
    )(flags, x_u, x_o, wp, wn, bias_row)

    # node-major coefficient rows (tiny arrays: N x (n_vars+1))
    cu_nm = cu[:, :N].T                               # (N, V1)
    co_nm = co[:, :N].T
    deg_u = deg[0, :N]
    deg_o = deg[1, :N]

    # generate_linear_ibf: expand the node-independent interval pattern once and scale the
    # j == 0 row of every (n_vars, 2) block by the node's coefficient for that block.
    iv = jnp.asarray(intervals, f32)                  # (n_vars, 2)
    base = jnp.ones((V1, n_vars, 2), f32)
    base = base.at[jnp.arange(n_vars), jnp.arange(n_vars), :].set(iv)
    base = base.reshape(R, 2)                         # row 0 of block 0 already holds intervals[0]
    j0 = (jnp.arange(R) % n_vars) == 0                # (R,)

    fac_u = jnp.where(j0[None, :], jnp.repeat(cu_nm, n_vars, axis=1), 1.0)   # (N, R)
    fac_o = jnp.where(j0[None, :], jnp.repeat(co_nm, n_vars, axis=1), 1.0)
    ibf_under = base[None, :, :] * fac_u[:, :, None]  # (N, R, 2)
    ibf_over = base[None, :, :] * fac_o[:, :, None]

    ones_v = jnp.ones((1, n_vars), f32)
    under_degrees = deg_u[:, None] * ones_v           # (N, n_vars)
    over_degrees = deg_o[:, None] * ones_v
    return ibf_under, ibf_over, under_degrees, over_degrees


def node_module_forward(n_vars, intervals, node_pos_weights, node_neg_weights, node_bias,
                        layer_inputs_under, layer_inputs_over,
                        layer_inputs_under_degrees=None, layer_inputs_over_degrees=None,
                        activation="linear"):
    """Single-node NodeModule.forward (matches the PyTorch API) -- 'linear' activation only."""
    if activation != "linear":
        # TODO(synk): 'relu' branch needs ibf_minmax_cpp / relu_monom_coeffs / quad_of_poly.
        raise NotImplementedError("only the 'linear' activation path is implemented")
    pos = jnp.asarray(node_pos_weights, jnp.float32).reshape(1, -1)
    neg = jnp.asarray(node_neg_weights, jnp.float32).reshape(1, -1)
    bias = jnp.asarray(node_bias, jnp.float32).reshape(1)
    iu, io, du, do = node_layer_forward(n_vars, intervals, pos, neg, bias,
                                        layer_inputs_under, layer_inputs_over)
    return iu[0], io[0], du[0], do[0]


# ----------------------------- pure-JAX reference (for checking) -----------------------------
def _ref_node(n_vars, intervals, pos_w, neg_w, bias, under, over):
    hp = jax.lax.Precision.HIGHEST

    def prod(inputs, weights):
        zero = bool(jnp.all(jnp.abs(weights) == 0.0)) or bool(jnp.all(jnp.abs(inputs) == 0.0))
        res = jnp.matmul(weights.reshape(1, -1), inputs, precision=hp)
        deg = jnp.zeros((n_vars,), jnp.float32) if zero else jnp.ones((n_vars,), jnp.float32)
        return res, deg

    c1, d1 = prod(over, neg_w)
    c2, d2 = prod(under, pos_w)
    iu = c1 + c2 + bias
    du = jnp.maximum(d1, d2)
    c3, d3 = prod(over, pos_w)
    c4, d4 = prod(under, neg_w)
    io = c3 + c4 + bias
    do = jnp.maximum(d3, d4)

    def gen(coeffs):
        c = coeffs.reshape(-1)
        blocks = []
        for i in range(n_vars + 1):
            blk = jnp.ones((n_vars, 2), jnp.float32)
            if i != n_vars:
                blk = blk.at[i, :].set(intervals[i])
            blk = blk.at[0, :].multiply(c[i])
            blocks.append(blk)
        return jnp.concatenate(blocks, axis=0)

    return gen(iu), gen(io), du, do


if __name__ == "__main__":
    n_vars = 4
    num_terms = (n_vars + 1) * n_vars   # 20 terms per previous-layer IBF

    key = jax.random.PRNGKey(0)
    k1, k2, k3, k4, k5 = jax.random.split(key, 5)

    layer_inputs_under = jax.random.normal(k1, (num_terms, n_vars + 1), jnp.float32)
    layer_inputs_over = layer_inputs_under + 0.1 * jnp.abs(
        jax.random.normal(k2, (num_terms, n_vars + 1), jnp.float32))

    w = jax.random.normal(k3, (num_terms,), jnp.float32)
    node_pos_weights = jnp.maximum(w, 0.0)
    node_neg_weights = jnp.minimum(w, 0.0)

    lo = jax.random.uniform(k4, (n_vars,), jnp.float32, minval=-1.0, maxval=0.0)
    hi = lo + jax.random.uniform(k5, (n_vars,), jnp.float32, minval=0.5, maxval=1.5)
    intervals = jnp.stack([lo, hi], axis=1)          # (n_vars, 2)

    node_bias = jnp.float32(0.3)

    # --- single-node forward (matches the PyTorch NodeModule API) ---
    ibf_under, ibf_over, deg_under, deg_over = jax.block_until_ready(
        node_module_forward(n_vars, intervals, node_pos_weights, node_neg_weights, node_bias,
                            layer_inputs_under, layer_inputs_over,
                            jnp.ones((n_vars,), jnp.float32), jnp.ones((n_vars,), jnp.float32),
                            activation="linear"))

    r_under, r_over, r_du, r_do = _ref_node(n_vars, intervals, node_pos_weights,
                                            node_neg_weights, node_bias,
                                            layer_inputs_under, layer_inputs_over)
    assert ibf_under.shape == ((n_vars + 1) * n_vars, 2)
    assert ibf_over.shape == ((n_vars + 1) * n_vars, 2)
    assert jnp.allclose(ibf_under, r_under, atol=1e-4, rtol=1e-4)
    assert jnp.allclose(ibf_over, r_over, atol=1e-4, rtol=1e-4)
    assert jnp.allclose(deg_under, r_du) and jnp.allclose(deg_over, r_do)

    # --- batched layer of nodes (the performance path): 6 nodes, last one all-zero weights ---
    n_nodes = 6
    kw, kb = jax.random.split(jax.random.PRNGKey(1), 2)
    w_nodes = jax.random.normal(kw, (n_nodes, num_terms), jnp.float32)
    w_nodes = w_nodes.at[-1].set(0.0)            # degenerate node -> degrees must be 0
    pos_nodes = jnp.maximum(w_nodes, 0.0)
    neg_nodes = jnp.minimum(w_nodes, 0.0)
    bias_nodes = jax.random.normal(kb, (n_nodes,), jnp.float32)

    bu, bo, bdu, bdo = jax.block_until_ready(
        node_layer_forward(n_vars, intervals, pos_nodes, neg_nodes, bias_nodes,
                           layer_inputs_under, layer_inputs_over))
    assert bu.shape == (n_nodes, (n_vars + 1) * n_vars, 2)
    assert bo.shape == (n_nodes, (n_vars + 1) * n_vars, 2)
    for n in range(n_nodes):
        ru, ro, rdu, rdo = _ref_node(n_vars, intervals, pos_nodes[n], neg_nodes[n],
                                     bias_nodes[n], layer_inputs_under, layer_inputs_over)
        assert jnp.allclose(bu[n], ru, atol=1e-4, rtol=1e-4)
        assert jnp.allclose(bo[n], ro, atol=1e-4, rtol=1e-4)
        assert jnp.allclose(bdu[n], rdu) and jnp.allclose(bdo[n], rdo)

    print("KERNEL_OK")
</pallas_src>

<mosaic_0001>
module attributes {stable_mosaic.version = 11 : i64} {
  func.func @_node_layer_kernel(%arg0: i32, %arg1: memref<2xi32, #tpu.memory_space<smem>>, %arg2: memref<5x20xf32, #tpu.memory_space<vmem>>, %arg3: memref<5x20xf32, #tpu.memory_space<vmem>>, %arg4: memref<20x128xf32, #tpu.memory_space<vmem>>, %arg5: memref<20x128xf32, #tpu.memory_space<vmem>>, %arg6: memref<1x128xf32, #tpu.memory_space<vmem>>, %arg7: memref<5x128xf32, #tpu.memory_space<vmem>>, %arg8: memref<5x128xf32, #tpu.memory_space<vmem>>, %arg9: memref<2x128xf32, #tpu.memory_space<vmem>>) attributes {dimension_semantics = [#tpu.dimension_semantics<parallel>], iteration_bounds = array<i64: 1>, scalar_prefetch = 1 : i64, scratch_operands = 0 : i64, tpu.core_type = #tpu.core_type<tc>, window_params = [{pipeline_mode = #tpu.pipeline_mode<synchronous>, transform_indices = @transform_0, window_bounds = array<i64: 5, 20>}, {pipeline_mode = #tpu.pipeline_mode<synchronous>, transform_indices = @transform_1, window_bounds = array<i64: 5, 20>}, {transform_indices = @transform_2, window_bounds = array<i64: 20, 128>}, {transform_indices = @transform_3, window_bounds = array<i64: 20, 128>}, {transform_indices = @transform_4, window_bounds = array<i64: 1, 128>}, {transform_indices = @transform_5, window_bounds = array<i64: 5, 128>}, {transform_indices = @transform_6, window_bounds = array<i64: 5, 128>}, {transform_indices = @transform_7, window_bounds = array<i64: 2, 128>}]} {
    %c0 = arith.constant 0 : index
    %c0_0 = arith.constant 0 : index
    %0 = vector.load %arg2[%c0, %c0_0] : memref<5x20xf32, #tpu.memory_space<vmem>>, vector<5x20xf32>
    %c0_1 = arith.constant 0 : index
    %c0_2 = arith.constant 0 : index
    %1 = vector.load %arg3[%c0_1, %c0_2] : memref<5x20xf32, #tpu.memory_space<vmem>>, vector<5x20xf32>
    %c0_3 = arith.constant 0 : index
    %c0_4 = arith.constant 0 : index
    %2 = vector.load %arg4[%c0_3, %c0_4] : memref<20x128xf32, #tpu.memory_space<vmem>>, vector<20x128xf32>
    %c0_5 = arith.constant 0 : index
    %c0_6 = arith.constant 0 : index
    %3 = vector.load %arg5[%c0_5, %c0_6] : memref<20x128xf32, #tpu.memory_space<vmem>>, vector<20x128xf32>
    %c0_7 = arith.constant 0 : index
    %c0_8 = arith.constant 0 : index
    %4 = vector.load %arg6[%c0_7, %c0_8] : memref<1x128xf32, #tpu.memory_space<vmem>>, vector<1x128xf32>
    %cst = arith.constant dense<0.000000e+00> : vector<5x128xf32>
    %5 = tpu.matmul %0, %2, %cst {dimension_numbers = #tpu.dot_dimension_numbers<[1], [0], [0], [1], [0, 0, 1, 1], [], []>} : vector<5x20xf32>, vector<20x128xf32>, vector<5x128xf32> -> vector<5x128xf32>
    %cst_9 = arith.constant dense<0.000000e+00> : vector<5x128xf32>
    %6 = tpu.matmul %1, %3, %cst_9 {dimension_numbers = #tpu.dot_dimension_numbers<[1], [0], [0], [1], [0, 0, 1, 1], [], []>} : vector<5x20xf32>, vector<20x128xf32>, vector<5x128xf32> -> vector<5x128xf32>
    %7 = arith.addf %5, %6 : vector<5x128xf32>
    %8 = vector.broadcast %4 : vector<1x128xf32> to vector<5x128xf32>
    %9 = arith.addf %7, %8 : vector<5x128xf32>
    %c0_10 = arith.constant 0 : index
    %c0_11 = arith.constant 0 : index
    %10 = vector.load %arg7[%c0_10, %c0_11] : memref<5x128xf32, #tpu.memory_space<vmem>>, vector<5x128xf32>
    tpu.vector_store %arg7[%c0_10, %c0_11], %9 {strides = array<i32>} : memref<5x128xf32, #tpu.memory_space<vmem>>, vector<5x128xf32>,
    %cst_12 = arith.constant dense<0.000000e+00> : vector<5x128xf32>
    %11 = tpu.matmul %1, %2, %cst_12 {dimension_numbers = #tpu.dot_dimension_numbers<[1], [0], [0], [1], [0, 0, 1, 1], [], []>} : vector<5x20xf32>, vector<20x128xf32>, vector<5x128xf32> -> vector<5x128xf32>
    %cst_13 = arith.constant dense<0.000000e+00> : vector<5x128xf32>
    %12 = tpu.matmul %0, %3, %cst_13 {dimension_numbers = #tpu.dot_dimension_numbers<[1], [0], [0], [1], [0, 0, 1, 1], [], []>} : vector<5x20xf32>, vector<20x128xf32>, vector<5x128xf32> -> vector<5x128xf32>
    %13 = arith.addf %11, %12 : vector<5x128xf32>
    %14 = vector.broadcast %4 : vector<1x128xf32> to vector<5x128xf32>
    %15 = arith.addf %13, %14 : vector<5x128xf32>
    %c0_14 = arith.constant 0 : index
    %c0_15 = arith.constant 0 : index
    %16 = vector.load %arg8[%c0_14, %c0_15] : memref<5x128xf32, #tpu.memory_space<vmem>>, vector<5x128xf32>
    tpu.vector_store %arg8[%c0_14, %c0_15], %15 {strides = array<i32>} : memref<5x128xf32, #tpu.memory_space<vmem>>, vector<5x128xf32>,
    %17 = math.absf %2 : vector<20x128xf32>
    %cst_16 = arith.constant dense<0xFF800000> : vector<128xf32>
    %18 = vector.multi_reduction <maximumf>, %17, %cst_16 [0] : vector<20x128xf32> to vector<128xf32>
    %19 = vector.shape_cast %18 : vector<128xf32> to vector<1x128xf32>
    %cst_17 = arith.constant 0.000000e+00 : f32
    %20 = vector.broadcast %cst_17 : f32 to vector<1x128xf32>
    %21 = arith.cmpf ogt, %19, %20 : vector<1x128xf32>
    %22 = math.absf %3 : vector<20x128xf32>
    %cst_18 = arith.constant dense<0xFF800000> : vector<128xf32>
    %23 = vector.multi_reduction <maximumf>, %22, %cst_18 [0] : vector<20x128xf32> to vector<128xf32>
    %24 = vector.shape_cast %23 : vector<128xf32> to vector<1x128xf32>
    %cst_19 = arith.constant 0.000000e+00 : f32
    %25 = vector.broadcast %cst_19 : f32 to vector<1x128xf32>
    %26 = arith.cmpf ogt, %24, %25 : vector<1x128xf32>
    %c0_20 = arith.constant 0 : index
    %27 = memref.load %arg1[%c0_20] : memref<2xi32, #tpu.memory_space<smem>>
    %c0_i32 = arith.constant 0 : i32
    %28 = arith.cmpi sgt, %27, %c0_i32 : i32
    %c1 = arith.constant 1 : index
    %29 = memref.load %arg1[%c1] : memref<2xi32, #tpu.memory_space<smem>>
    %c0_i32_21 = arith.constant 0 : i32
    %30 = arith.cmpi sgt, %29, %c0_i32_21 : i32
    %31 = vector.broadcast %28 : i1 to vector<1x128xi1>
    %32 = arith.andi %21, %31 : vector<1x128xi1>
    %33 = vector.broadcast %30 : i1 to vector<1x128xi1>
    %34 = arith.andi %26, %33 : vector<1x128xi1>
    %35 = arith.ori %32, %34 : vector<1x128xi1>
    %36 = arith.extui %35 : vector<1x128xi1> to vector<1x128xi32>
    %37 = arith.sitofp %36 : vector<1x128xi32> to vector<1x128xf32>
    %c0_22 = arith.constant 0 : index
    %c0_23 = arith.constant 0 : index
    %38 = vector.load %arg9[%c0_22, %c0_23] : memref<2x128xf32, #tpu.memory_space<vmem>>, vector<1x128xf32>
    tpu.vector_store %arg9[%c0_22, %c0_23], %37 {strides = array<i32>} : memref<2x128xf32, #tpu.memory_space<vmem>>, vector<1x128xf32>,
    %39 = vector.broadcast %28 : i1 to vector<1x128xi1>
    %40 = arith.andi %26, %39 : vector<1x128xi1>
    %41 = vector.broadcast %30 : i1 to vector<1x128xi1>
    %42 = arith.andi %21, %41 : vector<1x128xi1>
    %43 = arith.ori %40, %42 : vector<1x128xi1>
    %44 = arith.extui %43 : vector<1x128xi1> to vector<1x128xi32>
    %45 = arith.sitofp %44 : vector<1x128xi32> to vector<1x128xf32>
    %c1_24 = arith.constant 1 : index
    %c0_25 = arith.constant 0 : index
    %46 = vector.load %arg9[%c1_24, %c0_25] : memref<2x128xf32, #tpu.memory_space<vmem>>, vector<1x128xf32>
    tpu.vector_store %arg9[%c1_24, %c0_25], %45 {strides = array<i32>} : memref<2x128xf32, #tpu.memory_space<vmem>>, vector<1x128xf32>,
    return
  }
  func.func @transform_0(%arg0: i32, %arg1: memref<2xi32, #tpu.memory_space<smem>>) -> (i32, i32) {
    %c0_i32 = arith.constant 0 : i32
    %c0_i32_0 = arith.constant 0 : i32
    %c0_i32_1 = arith.constant 0 : i32
    return %c0_i32, %c0_i32_0 : i32, i32
  }
  func.func @transform_1(%arg0: i32, %arg1: memref<2xi32, #tpu.memory_space<smem>>) -> (i32, i32) {
    %c0_i32 = arith.constant 0 : i32
    %c0_i32_0 = arith.constant 0 : i32
    %c0_i32_1 = arith.constant 0 : i32
    return %c0_i32, %c0_i32_0 : i32, i32
  }
  func.func @transform_2(%arg0: i32, %arg1: memref<2xi32, #tpu.memory_space<smem>>) -> (i32, i32) {
    %c0_i32 = arith.constant 0 : i32
    %c0_i32_0 = arith.constant 0 : i32
    return %c0_i32, %arg0 : i32, i32
  }
  func.func @transform_3(%arg0: i32, %arg1: memref<2xi32, #tpu.memory_space<smem>>) -> (i32, i32) {
    %c0_i32 = arith.constant 0 : i32
    %c0_i32_0 = arith.constant 0 : i32
    return %c0_i32, %arg0 : i32, i32
  }
  func.func @transform_4(%arg0: i32, %arg1: memref<2xi32, #tpu.memory_space<smem>>) -> (i32, i32) {
    %c0_i32 = arith.constant 0 : i32
    %c0_i32_0 = arith.constant 0 : i32
    return %c0_i32, %arg0 : i32, i32
  }
  func.func @transform_5(%arg0: i32, %arg1: memref<2xi32, #tpu.memory_space<smem>>) -> (i32, i32) {
    %c0_i32 = arith.constant 0 : i32
    %c0_i32_0 = arith.constant 0 : i32
    return %c0_i32, %arg0 : i32, i32
  }
  func.func @transform_6(%arg0: i32, %arg1: memref<2xi32, #tpu.memory_space<smem>>) -> (i32, i32) {
    %c0_i32 = arith.constant 0 : i32
    %c0_i32_0 = arith.constant 0 : i32
    return %c0_i32, %arg0 : i32, i32
  }
  func.func @transform_7(%arg0: i32, %arg1: memref<2xi32, #tpu.memory_space<smem>>) -> (i32, i32) {
    %c0_i32 = arith.constant 0 : i32
    %c0_i32_0 = arith.constant 0 : i32
    return %c0_i32, %arg0 : i32, i32
  }
}

</mosaic_0001>

<bundles_post_ra>
// kernel: mul.24
= control target key start
LH: loop header
LB: loop body
LE: loop exit
PB: predicated region body
PF: predicated region fallthrough
CT: control target
= control target key end

     0   :  { %s55_s0 = inlined_call_operand.<no memory space> [shape: f32[], index: 0, kind: input, shape index: {}]   ;;  %s56_s1 = inlined_call_operand.hbm [shape: f32[1,4], index: 1, kind: output, shape index: {}]  }
   0x1   :  { %v2_v0 = vstv %s55_s0 }
   0x2   :  { %3 = vsyncpa [#allocation1], 0  ;;  %4 = vst [vmem:[#allocation0] sm:$0x1] %v2_v0  ;;  %s38_s0 = smov [#allocation0]  }
   0x3   :  { %s9_s8 = sshll.u32 %s38_s0, 4  ;;  %s10_s8 = int_to_ptr.vmem [resolvable:$true] %s9_s8 }
   0x4   :  { %s16_s9 = scalar_lea.vmem %s10_s8, 16  ;;  %s20_s10 = scalar_lea.vmem %s10_s8, 32 }
   0x5   :  { %p17_p0 = scmp.ne.s32.totalorder %s10_s8, %s16_s9  ;;  %p21_p1 = scmp.lt.s32.totalorder %s10_s8, %s10_s8 }
   0x6   :  { %p22_p2 = scmp.lt.s32.totalorder %s20_s10, %s16_s9 }
   0x8   :  { %p23_p3 = por %p22_p2, %p21_p1 }
   0xa   :  { %p24_p4 = pnand %p23_p3, %p17_p0 }
   0xc   :  { %27 = shalt.err (!%p24_p4)
}
   0xd   :  { %12 = dma.vmem_to_hbm [thread:$0]  %s10_s8, 16, %s56_s1, [#allocation1]  }
   0xe   :  { %36 = dma.done.wait [#allocation1], 16  }
   0xf   :  { %37 = vsyncadd [#allocation1], 4294967280 }
  0x10   :  { %14 = vsyncpa [#allocation1], 1 }

// kernel: node_layer_forward.1
= control target key start
LH: loop header
LB: loop body
LE: loop exit
PB: predicated region body
PF: predicated region fallthrough
CT: control target
= control target key end

     0   :  { %s614_s0 = inlined_call_operand.vmem [shape: s32[2], index: 0, kind: input, shape index: {}]   ;;  %s615_s1 = inlined_call_operand.vmem [shape: f32[5,20], index: 1, kind: input, shape index: {}]   ;;  %s616_s2 = inlined_call_operand.vmem [shape: f32[5,20], index: 2, kind: input, shape index: {}]   ;;  %s617_s3 = inlined_call_operand.vmem [shape: f32[20,128], index: 3, kind: input, shape index: {}]   ;;  %s618_s4 = inlined_call_operand.vmem [shape: f32[20,128], index: 4, kind: input, shape index: {}]   ;;  %s619_s5 = inlined_call_operand.vmem [shape: f32[1,128], index: 5, kind: input, shape index: {}]   ;;  %s620_s6 = inlined_call_operand.vmem [shape: f32[5,128], index: 6, kind: output, shape index: {0}]   ;;  %s621_s7 = inlined_call_operand.vmem [shape: f32[5,128], index: 7, kind: output, shape index: {1}]   ;;  %s622_s8 = inlined_call_operand.vmem [shape: f32[2,128], index: 8, kind: output, shape index: {2}]  }
   0x1   :  { %s14_s29 = sshll.u32 %s614_s0, 4  ;;  %s15_s29 = int_to_ptr.vmem [resolvable:$true] %s14_s29 }
   0x2   :  { %s470_s30 = scalar_lea.vmem %s15_s29, 16  ;;  %p475_p1 = scmp.lt.s32.totalorder %s15_s29, %s15_s29 }
   0x3   :  { %p471_p0 = scmp.ne.s32.totalorder %s15_s29, %s470_s30  ;;  %p476_p2 = scmp.lt.s32.totalorder %s470_s30, %s470_s30 }
   0x5   :  { %p477_p3 = por %p476_p2, %p475_p1 }
   0x7   :  { %p478_p4 = pnand %p477_p3, %p471_p0 }
   0x9   :  { %481 = shalt.err (!%p478_p4)  }
   0xa   :  { %s484_s9 = smov [#allocation3]  }
   0xb   :  { %17 = dma.vmem_to_smem %s15_s29, 16, %s484_s9, [#allocation2] }
   0xc   :  { %482 = dma.done.wait [#allocation2], 16 }
   0xd   :  { %483 = vsyncadd [#allocation2], 4294967280 }
   0xe   :  { %19 = sfence }
   0xf   :  { %v37_v0 = vld [vmem:[%s618_s4 + $0x10] sm:$0xf]  ;;  %vm43_vm0 = vcmask 1043456   ;;  %v485_v2 = vmov 0.0   ;;  %v36_v5 = vld [vmem:[%s618_s4 + $0x8] sm:$0xff]  ;;  %v35_v9 = vld [vmem:[%s618_s4] sm:$0xff] }
  0x10   :  { %v34_v1 = vld [vmem:[%s617_s3 + $0x10] sm:$0xf]  ;;  %431 = vmatprep.subr.mxu0 %v485_v2  ;;  %440 = vmatprep.subr.mxu1 %v485_v2  ;;  %v358_v3 = vand.u32 2147483647, %v37_v0  ;;  %v33_v6 = vld [vmem:[%s617_s3 + $0x8] sm:$0xff]  ;;  %s556_s19 = sld [smem:[#allocation3]] }
  0x11   :  { %v345_v4 = vand.u32 2147483647, %v34_v1  ;;  %432 = vmatpush3.msk.msra.mxu0 %vm43_vm0, %v37_v0  ;;  %441 = vmatpush3.msk.msra.mxu1 %vm43_vm0, %v34_v1  ;;  %v357_v7 = vand.u32 2147483647, %v36_v5  ;;  %v344_v8 = vand.u32 2147483647, %v33_v6 }
  0x12   :  { %433 = vmatprep.subr.mxu0 %v485_v2  ;;  %442 = vmatprep.subr.mxu1 %v485_v2  ;;  %v356_v10 = vand.u32 2147483647, %v35_v9  ;;  %v359_v11 = vsel %vm43_vm0, %v358_v3, -inf  ;;  %s559_s20 = sld [smem:[#allocation3 + $0x1]]  ;;  %v32_v12 = vld [vmem:[%s617_s3] sm:$0xff]  ;;  %vm39_vm1 = vcmask 162816  }
  0x13   :  { %434 = vmatpush3.msra.mxu0 %v36_v5  ;;  %443 = vmatpush3.msra.mxu1 %v33_v6  ;;  %v31_v13 = vld [vmem:[%s616_s2] sm:$0x1f]  ;;  %v343_v15 = vand.u32 2147483647, %v32_v12  ;;  %v346_v17 = vsel %vm43_vm0, %v345_v4, -inf  ;;  %vm486_vm2 = vmmov 0  }
  0x14   :  { %435 = vmatprep.subr.mxu0 %v485_v2  ;;  %444 = vmatprep.subr.mxu1 %v485_v2  ;;  %v360_v14 = vmax.f32.f32 %v356_v10, %v357_v7  ;;  %v30_v16 = vld [vmem:[%s615_s1] sm:$0x1f] }
  0x15   :  { %436 = vmatpush3.msra.mxu0 %v35_v9  ;;  %437 = vmatprep.mubr.msk.f32.mxu0 %vm486_vm2, %v485_v2  ;;  %v347_v19 = vmax.f32.f32 %v343_v15, %v344_v8  ;;  %v407_v38 = vld [vmem:[%s619_s5] ss:$0 sm:$0xff] }
  0x16   :  { %v361_v18 = vmax.f32 %v360_v14, %v359_v11  ;;  %445 = vmatpush3.msra.mxu1 %v32_v12  ;;  %446 = vmatprep.mubr.msk.f32.mxu1 %vm486_vm2, %v485_v2  ;;  %p370_p5 = scmp.gt.s32.totalorder %s556_s19, 0 }
  0x17   :  { %438 = vmatmul.mubr.msk.f32.vlgmr.msra.gmra.mxu0 %vm39_vm1, %v31_v13  ;;  %447 = vmatmul.mubr.msk.f32.vlgmr.msra.gmra.mxu1 %vm39_vm1, %v30_v16  ;;  %v348_v21 = vmax.f32 %v347_v19, %v346_v17 }
  0x18   :  { %v362_v20 = vrot.slane %v361_v18, 4  ;;  %449 = vmatprep.subr.mxu0 %v485_v2  ;;  %458 = vmatprep.subr.mxu1 %v485_v2  ;;  %p372_p6 = scmp.gt.s32.totalorder %s559_s20, 0 }
  0x19   :  { %450 = vmatpush3.msk.msra.mxu0 %vm43_vm0, %v37_v0  ;;  %459 = vmatpush3.msk.msra.mxu1 %vm43_vm0, %v34_v1  ;;  %v349_v23 = vrot.slane %v348_v21, 4  ;;  %s373_s2 = scalar_select %p370_p5, 1, 0 }
  0x1a   :  { %v363_v22 = vmax.f32 %v361_v18, %v362_v20  ;;  %451 = vmatprep.subr.mxu0 %v485_v2  ;;  %460 = vmatprep.subr.mxu1 %v485_v2  ;;  %s377_s1 = scalar_select %p372_p6, 1, 0 }
  0x1b   :  { %452 = vmatpush3.msra.mxu0 %v36_v5  ;;  %461 = vmatpush3.msra.mxu1 %v33_v6  ;;  %v350_v25 = vmax.f32 %v348_v21, %v349_v23  ;;  %v374_v30 = vstv %s373_s2 }
  0x1c   :  { %v364_v24 = vrot.slane %v363_v22, 2  ;;  %453 = vmatprep.subr.mxu0 %v485_v2  ;;  %462 = vmatprep.subr.mxu1 %v485_v2  ;;  %v378_v28 = vstv %s377_s1  ;;  %vm375_vm4 = vcmp.eq.s32.totalorder %v374_v30, 1 }
  0x1d   :  { %454 = vmatpush3.msra.mxu0 %v35_v9  ;;  %455 = vmatprep.mubr.msk.f32.mxu0 %vm486_vm2, %v485_v2  ;;  %v351_v27 = vrot.slane %v350_v25, 2  ;;  %vm379_vm3 = vcmp.eq.s32.totalorder %v378_v28, 1 }
  0x1e   :  { %v365_v26 = vmax.f32 %v363_v22, %v364_v24  ;;  %463 = vmatpush3.msra.mxu1 %v32_v12  ;;  %464 = vmatprep.mubr.msk.f32.mxu1 %vm486_vm2, %v485_v2 }
  0x1f   :  { %456 = vmatmul.mubr.msk.f32.vlgmr.msra.gmra.mxu0 %vm39_vm1, %v30_v16  ;;  %465 = vmatmul.mubr.msk.f32.vlgmr.msra.gmra.mxu1 %vm39_vm1, %v31_v13  ;;  %v352_v31 = vmax.f32 %v350_v25, %v351_v27 }
  0x20   :  { %v366_v29 = vrot.slane %v365_v26, 1 }
  0x21   :  { %v353_v33 = vrot.slane %v352_v31, 1 }
  0x22   :  { %v367_v32 = vmax.f32 %v365_v26, %v366_v29 }
  0x23   :  { %v354_v34 = vmax.f32 %v352_v31, %v353_v33 }
  0x24   :  { %vm368_vm5 = vcmp.gt.f32.partialorder %v367_v32, 0.0 }
  0x25   :  { %vm380_vm6 = vmand %vm368_vm5, %vm379_vm3  ;;  %vm355_vm8 = vcmp.gt.f32.partialorder %v354_v34, 0.0 }
  0x26   :  { %vm385_vm7 = vmand %vm368_vm5, %vm375_vm4 }
  0x27   :  { %vm376_vm9 = vmand %vm355_vm8, %vm375_vm4 }
  0x28   :  { %vm381_vm10 = vmor %vm376_vm9, %vm380_vm6 }
  0x29   :  { %v413_v35 = vsel %vm381_vm10, 1.0, %v485_v2  ;;  %vm386_vm11 = vmand %vm355_vm8, %vm379_vm3 }
  0x2a   :  { %384 = vst [vmem:[%s622_s8] sm:$0x1] %v413_v35  ;;  %vm387_vm12 = vmor %vm385_vm7, %vm386_vm11 }
  0x2b   :  { %v414_v36 = vsel %vm387_vm12, 1.0, %v485_v2 }
  0x2c   :  { %390 = vst [vmem:[%s622_s8 + $0x1] sm:$0x1] %v414_v36 }
  0xd7   :  { %v113_v37 = vpop.f32.mrf.mxu0  ;;  %v189_v39 = vpop.f32.mrf.mxu1 }
  0xd8   :  { %v190_v40 = vadd.f32 %v189_v39, %v113_v37 }
  0xd9   :  { %v439_v41 = vpop.f32.mrf.mxu0  ;;  %v448_v42 = vpop.f32.mrf.mxu1 }
  0xda   :  { %v199_v43 = vadd.f32 %v407_v38, %v190_v40 }
  0xdc   :  { %200 = vst [vmem:[%s620_s6] sm:$0x1f] %v199_v43 }
  0xdf   :  { %v267_v44 = vpop.f32.mrf.mxu0  ;;  %v337_v45 = vpop.f32.mrf.mxu1 }
  0xe0   :  { %v338_v46 = vadd.f32 %v337_v45, %v267_v44 }
  0xe1   :  { %v457_v47 = vpop.f32.mrf.mxu0  ;;  %v466_v48 = vpop.f32.mrf.mxu1 }
  0xe2   :  { %v341_v49 = vadd.f32 %v407_v38, %v338_v46 }
  0xe4   :  { %342 = vst [vmem:[%s621_s7] sm:$0x1f] %v341_v49 }

</bundles_post_ra>
